<compile_context>
chip_gen: v7x
topology: tpu7x:2x2x1
jax: 0.10.0
libtpu: 0.0.40
codegen_flags: <defaults>
</compile_context>

<pallas_src>
import functools

import jax
import jax.numpy as jnp
import numpy as np
from jax.experimental import pallas as pl
from jax.experimental.pallas import tpu as pltpu


# ---------------------------------------------------------------------------
# Helpers
# ---------------------------------------------------------------------------
def _round_up(x, m):
    return (x + m - 1) // m * m


def _choose_batch_tiling(b):
    """Pick (batch_tile, padded_batch). Tile is sublane-aligned, capped at 256."""
    bpad8 = _round_up(max(int(b), 1), 8)
    tb = min(bpad8, 256)
    bpad = _round_up(bpad8, tb)
    return tb, bpad


# ---------------------------------------------------------------------------
# Kernel
# ---------------------------------------------------------------------------
def _make_kernel(nstage, compute_dtype_name):
    """Fused MLP kernel over one batch tile.

    refs layout: (x, w_0..w_{nstage-1}, b_0..b_{nstage-1}, out)
    Stage i:  h <- h @ w_i + b_i ; ReLU for all stages but the last.
    Stages 0..nlayer-1 are the trunk, stage nlayer is the fused head first
    layers [We1 | Wi1], stage nlayer+1 is blockdiag(We2, Wi2).
    """
    compute_dtype = jnp.dtype(compute_dtype_name)

    def kernel(*refs):
        x_ref = refs[0]
        w_refs = refs[1:1 + nstage]
        b_refs = refs[1 + nstage:1 + 2 * nstage]
        out_ref = refs[1 + 2 * nstage]

        h = x_ref[...].astype(jnp.float32)                 # (TB, P0) f32
        for i in range(nstage):                            # static unroll
            lhs = h.astype(compute_dtype)                  # bf16 only at MXU input
            h = jnp.dot(lhs, w_refs[i][...],
                        preferred_element_type=jnp.float32) + b_refs[i][...]
            if i < nstage - 1:
                h = jnp.maximum(h, 0.0)                    # ReLU stays f32 (v5e VPU)
        out_ref[...] = h.astype(out_ref.dtype)             # lane-dense (TB, Plast) store

    return kernel


# ---------------------------------------------------------------------------
# Parameter packing (do once per set of weights; reuse across forward calls)
# ---------------------------------------------------------------------------
def pack_params(params, *, weights_dtype=jnp.float32):
    """Pack trunk + fused heads into per-stage, 128-lane-padded weight/bias arrays."""
    net = [(jnp.asarray(W, jnp.float32), jnp.asarray(b, jnp.float32))
           for W, b in params["net"]]
    (We1, be1), (We2, be2) = [(jnp.asarray(W, jnp.float32), jnp.asarray(b, jnp.float32))
                              for W, b in params["lag_eq"]]
    (Wi1, bi1), (Wi2, bi2) = [(jnp.asarray(W, jnp.float32), jnp.asarray(b, jnp.float32))
                              for W, b in params["lag_ineq"]]
    neq = int(We2.shape[1])
    nineq = int(Wi2.shape[1])
    nhead = neq + nineq

    # Fuse the two head first layers along the output dim.
    Wh1 = jnp.concatenate([We1, Wi1], axis=1)              # (nhidden, nhead)
    bh1 = jnp.concatenate([be1, bi1], axis=0)
    # Fuse the two head second layers into one block-diagonal matmul (exact).
    Wh2 = (jnp.zeros((nhead, nhead), jnp.float32)
           .at[:neq, :neq].set(We2)
           .at[neq:, neq:].set(Wi2))
    bh2 = jnp.concatenate([be2, bi2], axis=0)

    stages = list(net) + [(Wh1, bh1), (Wh2, bh2)]
    xdim = int(stages[0][0].shape[0])
    dims = [xdim] + [int(W.shape[1]) for W, _ in stages]
    pdims = tuple(_round_up(d, 128) for d in dims)          # per-stage lane padding

    weights, biases = [], []
    for i, (W, b) in enumerate(stages):
        pin, pout = pdims[i], pdims[i + 1]
        # Zero-padding is exact: padded rows/cols contribute 0 and ReLU(0) = 0.
        Wp = jnp.pad(W, ((0, pin - W.shape[0]), (0, pout - W.shape[1])))
        weights.append(Wp.astype(weights_dtype))             # bf16 option (v6e/v7x)
        biases.append(jnp.pad(b, (0, pout - b.shape[0]))[None, :])  # bias kept f32
    return {
        "weights": tuple(weights),
        "biases": tuple(biases),
        "pdims": pdims,
        "xdim": xdim,
        "neq": neq,
        "nineq": nineq,
        "nstage": len(stages),
        "w_dtype": jnp.dtype(weights_dtype).name,
    }


# ---------------------------------------------------------------------------
# Forward construction (cached per static config) + public API
# ---------------------------------------------------------------------------
def _vmem_estimate_bytes(pdims, tb, w_itemsize):
    w = sum(pdims[i] * pdims[i + 1] for i in range(len(pdims) - 1)) * w_itemsize
    b = sum(pdims[1:]) * 4
    io = 2 * (tb * pdims[0] * 4 + tb * pdims[-1] * 4)        # double-buffered x / out
    return w + b + io


@functools.lru_cache(maxsize=None)
def _build_forward(b, tb, bpad, xdim, neq, nineq, pdims, nstage, w_dtype_name):
    p0, plast = pdims[0], pdims[-1]
    grid = (bpad // tb,)

    in_specs = [pl.BlockSpec((tb, p0), lambda i: (i, 0))]                 # batch tile
    for s in range(nstage):                                                # weights: resident
        in_specs.append(pl.BlockSpec((pdims[s], pdims[s + 1]), lambda i: (0, 0)))
    for s in range(nstage):                                                # biases: resident
        in_specs.append(pl.BlockSpec((1, pdims[s + 1]), lambda i: (0, 0)))
    out_specs = pl.BlockSpec((tb, plast), lambda i: (i, 0))

    est = _vmem_estimate_bytes(pdims, tb, jnp.dtype(w_dtype_name).itemsize)
    vmem_limit = None
    if est > 24 * 1024 * 1024:
        vmem_limit = min(int(est * 1.5), 100 * 1024 * 1024)

    pcall = pl.pallas_call(
        _make_kernel(nstage, w_dtype_name),
        out_shape=jax.ShapeDtypeStruct((bpad, plast), jnp.float32),
        grid=grid,
        in_specs=in_specs,
        out_specs=out_specs,
        compiler_params=pltpu.CompilerParams(
            dimension_semantics=("parallel",),               # shards batch tiles on v7x
            vmem_limit_bytes=vmem_limit),
    )

    def fwd(x2d, weights, biases):
        # Pad batch rows to the tile grid and features to 128 lanes (fused under jit).
        xp = jnp.zeros((bpad, p0), jnp.float32).at[:b, :xdim].set(
            x2d.astype(jnp.float32))
        out = pcall(xp, *weights, *biases)
        return out[:b, :neq], out[:b, neq:neq + nineq]

    return jax.jit(fwd)


def nn_dual_acopf_forward_batched(pd, qd, packed):
    """Batched forward: pd, qd are (B, nload). Returns ((B, neq), (B, nineq))."""
    x2d = jnp.concatenate([jnp.atleast_2d(pd), jnp.atleast_2d(qd)], axis=-1)
    b = int(x2d.shape[0])
    tb, bpad = _choose_batch_tiling(b)
    fwd = _build_forward(b, tb, bpad, packed["xdim"], packed["neq"],
                         packed["nineq"], packed["pdims"], packed["nstage"],
                         packed["w_dtype"])
    return fwd(x2d, packed["weights"], packed["biases"])


def nn_dual_acopf_forward_packed(pd, qd, packed):
    """Single-sample forward matching the module API: returns ((neq,), (nineq,))."""
    eq, ineq = nn_dual_acopf_forward_batched(pd[None, :], qd[None, :], packed)
    return eq[0], ineq[0]


def nn_dual_acopf_forward(pd, qd, params):
    """Convenience wrapper (re-packs every call). Do NOT use inside the solver loop."""
    return nn_dual_acopf_forward_packed(pd, qd, pack_params(params))


# ---------------------------------------------------------------------------
# Parameter construction (mimics torch.nn.Linear defaults + zero-init heads)
# ---------------------------------------------------------------------------
def _linear_init(key, fan_in, fan_out):
    kw, kb = jax.random.split(key)
    bound = 1.0 / np.sqrt(fan_in)
    W = jax.random.uniform(kw, (fan_in, fan_out), jnp.float32, -bound, bound)
    b = jax.random.uniform(kb, (fan_out,), jnp.float32, -bound, bound)
    return W, b


def build_params(key, nload, neq, nineq, hiddenfrac, nlayer, zero_init_heads=True):
    xdim = 2 * nload
    nout = neq + nineq
    nhidden = int(hiddenfrac * nout)
    layer_sizes = [xdim] + nlayer * [nhidden]

    keys = jax.random.split(key, nlayer + 4)
    net = [_linear_init(keys[i], a, b)
           for i, (a, b) in enumerate(zip(layer_sizes[:-1], layer_sizes[1:]))]

    We1, be1 = _linear_init(keys[nlayer], layer_sizes[-1], neq)
    Wi1, bi1 = _linear_init(keys[nlayer + 1], layer_sizes[-1], nineq)
    if zero_init_heads:   # matches nn.init.zeros_ on the head output layers
        We2, be2 = jnp.zeros((neq, neq), jnp.float32), jnp.zeros((neq,), jnp.float32)
        Wi2, bi2 = jnp.zeros((nineq, nineq), jnp.float32), jnp.zeros((nineq,), jnp.float32)
    else:                 # non-zero heads: used only to numerically exercise the kernel
        We2, be2 = _linear_init(keys[nlayer + 2], neq, neq)
        Wi2, bi2 = _linear_init(keys[nlayer + 3], nineq, nineq)

    return {"net": net, "lag_eq": [(We1, be1), (We2, be2)],
            "lag_ineq": [(Wi1, bi1), (Wi2, bi2)]}


def reference_forward(x, params):
    """Pure-JAX reference mirroring the PyTorch forward (works for 1D or 2D x)."""
    h = x
    for W, b in params["net"]:
        h = jax.nn.relu(h @ W + b)
    We1, be1 = params["lag_eq"][0]
    We2, be2 = params["lag_eq"][1]
    eq = jax.nn.relu(h @ We1 + be1) @ We2 + be2
    Wi1, bi1 = params["lag_ineq"][0]
    Wi2, bi2 = params["lag_ineq"][1]
    ineq = jax.nn.relu(h @ Wi1 + bi1) @ Wi2 + bi2
    return eq, ineq


if __name__ == "__main__":
    # Small synthetic ACOPF-like problem sizes.
    nload, neq, nineq = 16, 24, 40
    hiddenfrac, nlayer = 0.5, 2           # nhidden = int(0.5 * 64) = 32
    B = 8                                  # fills all 8 sublane rows with real samples

    key = jax.random.PRNGKey(0)
    kp, kq, kparam0, kparam1 = jax.random.split(key, 4)
    pd = jax.random.normal(kp, (B, nload), jnp.float32)
    qd = jax.random.normal(kq, (B, nload), jnp.float32)
    x2d = jnp.concatenate([pd, qd], axis=-1)

    # (a) Module-faithful init (zero-initialized head output layers).
    params0 = build_params(kparam0, nload, neq, nineq, hiddenfrac, nlayer,
                           zero_init_heads=True)
    packed0 = pack_params(params0)
    eq0, ineq0 = nn_dual_acopf_forward_batched(pd, qd, packed0)
    jax.block_until_ready((eq0, ineq0))
    eq0_ref, ineq0_ref = reference_forward(x2d, params0)
    np.testing.assert_allclose(np.asarray(eq0), np.asarray(eq0_ref), rtol=1e-5, atol=1e-5)
    np.testing.assert_allclose(np.asarray(ineq0), np.asarray(ineq0_ref), rtol=1e-5, atol=1e-5)

    # (b) Non-zero head output layers: exercises the full compute path numerically.
    params = build_params(kparam1, nload, neq, nineq, hiddenfrac, nlayer,
                          zero_init_heads=False)
    packed = pack_params(params)          # pack once; reuse across solver iterations
    eq_b, ineq_b = nn_dual_acopf_forward_batched(pd, qd, packed)
    jax.block_until_ready((eq_b, ineq_b))
    eq_ref, ineq_ref = reference_forward(x2d, params)
    np.testing.assert_allclose(np.asarray(eq_b), np.asarray(eq_ref), rtol=1e-5, atol=1e-5)
    np.testing.assert_allclose(np.asarray(ineq_b), np.asarray(ineq_ref), rtol=1e-5, atol=1e-5)
    assert eq_b.shape == (B, neq) and ineq_b.shape == (B, nineq)

    # (c) Single-sample API (matches the original module's forward signature).
    eq1, ineq1 = nn_dual_acopf_forward_packed(pd[0], qd[0], packed)
    jax.block_until_ready((eq1, ineq1))
    np.testing.assert_allclose(np.asarray(eq1), np.asarray(eq_ref[0]), rtol=1e-5, atol=1e-5)
    np.testing.assert_allclose(np.asarray(ineq1), np.asarray(ineq_ref[0]), rtol=1e-5, atol=1e-5)
    assert eq1.shape == (neq,) and ineq1.shape == (nineq,)

    # (d) bf16 weight storage (v6e/v7x): f32 accumulate, loose tolerance vs f32 ref.
    packed_bf16 = pack_params(params, weights_dtype=jnp.bfloat16)
    eq16, ineq16 = nn_dual_acopf_forward_batched(pd, qd, packed_bf16)
    jax.block_until_ready((eq16, ineq16))
    np.testing.assert_allclose(np.asarray(eq16), np.asarray(eq_ref), rtol=1e-1, atol=1e-1)
    np.testing.assert_allclose(np.asarray(ineq16), np.asarray(ineq_ref), rtol=1e-1, atol=1e-1)

    print("KERNEL_OK")
</pallas_src>

<mosaic_0001>
module attributes {stable_mosaic.version = 11 : i64} {
  func.func @kernel(%arg0: i32, %arg1: memref<8x128xf32, #tpu.memory_space<vmem>>, %arg2: memref<128x128xf32, #tpu.memory_space<vmem>>, %arg3: memref<128x128xf32, #tpu.memory_space<vmem>>, %arg4: memref<128x128xf32, #tpu.memory_space<vmem>>, %arg5: memref<128x128xf32, #tpu.memory_space<vmem>>, %arg6: memref<1x128xf32, #tpu.memory_space<vmem>>, %arg7: memref<1x128xf32, #tpu.memory_space<vmem>>, %arg8: memref<1x128xf32, #tpu.memory_space<vmem>>, %arg9: memref<1x128xf32, #tpu.memory_space<vmem>>, %arg10: memref<8x128xf32, #tpu.memory_space<vmem>>) attributes {dimension_semantics = [#tpu.dimension_semantics<parallel>], iteration_bounds = array<i64: 1>, scalar_prefetch = 0 : i64, scratch_operands = 0 : i64, tpu.core_type = #tpu.core_type<tc>, window_params = [{transform_indices = @transform_0, window_bounds = array<i64: 8, 128>}, {pipeline_mode = #tpu.pipeline_mode<synchronous>, transform_indices = @transform_1, window_bounds = array<i64: 128, 128>}, {pipeline_mode = #tpu.pipeline_mode<synchronous>, transform_indices = @transform_2, window_bounds = array<i64: 128, 128>}, {pipeline_mode = #tpu.pipeline_mode<synchronous>, transform_indices = @transform_3, window_bounds = array<i64: 128, 128>}, {pipeline_mode = #tpu.pipeline_mode<synchronous>, transform_indices = @transform_4, window_bounds = array<i64: 128, 128>}, {pipeline_mode = #tpu.pipeline_mode<synchronous>, transform_indices = @transform_5, window_bounds = array<i64: 1, 128>}, {pipeline_mode = #tpu.pipeline_mode<synchronous>, transform_indices = @transform_6, window_bounds = array<i64: 1, 128>}, {pipeline_mode = #tpu.pipeline_mode<synchronous>, transform_indices = @transform_7, window_bounds = array<i64: 1, 128>}, {pipeline_mode = #tpu.pipeline_mode<synchronous>, transform_indices = @transform_8, window_bounds = array<i64: 1, 128>}, {transform_indices = @transform_9, window_bounds = array<i64: 8, 128>}]} {
    %c0 = arith.constant 0 : index
    %c0_0 = arith.constant 0 : index
    %0 = vector.load %arg1[%c0, %c0_0] : memref<8x128xf32, #tpu.memory_space<vmem>>, vector<8x128xf32>
    %c0_1 = arith.constant 0 : index
    %c0_2 = arith.constant 0 : index
    %1 = vector.load %arg2[%c0_1, %c0_2] : memref<128x128xf32, #tpu.memory_space<vmem>>, vector<128x128xf32>
    %cst = arith.constant dense<0.000000e+00> : vector<8x128xf32>
    %2 = tpu.matmul %0, %1, %cst {dimension_numbers = #tpu.dot_dimension_numbers<[1], [0], [0], [1], [0, 0, 1, 1], [], []>} : vector<8x128xf32>, vector<128x128xf32>, vector<8x128xf32> -> vector<8x128xf32>
    %c0_3 = arith.constant 0 : index
    %c0_4 = arith.constant 0 : index
    %3 = vector.load %arg6[%c0_3, %c0_4] : memref<1x128xf32, #tpu.memory_space<vmem>>, vector<1x128xf32>
    %4 = vector.broadcast %3 : vector<1x128xf32> to vector<8x128xf32>
    %5 = arith.addf %2, %4 : vector<8x128xf32>
    %cst_5 = arith.constant 0.000000e+00 : f32
    %6 = vector.broadcast %cst_5 : f32 to vector<8x128xf32>
    %7 = arith.maximumf %5, %6 : vector<8x128xf32>
    %c0_6 = arith.constant 0 : index
    %c0_7 = arith.constant 0 : index
    %8 = vector.load %arg3[%c0_6, %c0_7] : memref<128x128xf32, #tpu.memory_space<vmem>>, vector<128x128xf32>
    %cst_8 = arith.constant dense<0.000000e+00> : vector<8x128xf32>
    %9 = tpu.matmul %7, %8, %cst_8 {dimension_numbers = #tpu.dot_dimension_numbers<[1], [0], [0], [1], [0, 0, 1, 1], [], []>} : vector<8x128xf32>, vector<128x128xf32>, vector<8x128xf32> -> vector<8x128xf32>
    %c0_9 = arith.constant 0 : index
    %c0_10 = arith.constant 0 : index
    %10 = vector.load %arg7[%c0_9, %c0_10] : memref<1x128xf32, #tpu.memory_space<vmem>>, vector<1x128xf32>
    %11 = vector.broadcast %10 : vector<1x128xf32> to vector<8x128xf32>
    %12 = arith.addf %9, %11 : vector<8x128xf32>
    %cst_11 = arith.constant 0.000000e+00 : f32
    %13 = vector.broadcast %cst_11 : f32 to vector<8x128xf32>
    %14 = arith.maximumf %12, %13 : vector<8x128xf32>
    %c0_12 = arith.constant 0 : index
    %c0_13 = arith.constant 0 : index
    %15 = vector.load %arg4[%c0_12, %c0_13] : memref<128x128xf32, #tpu.memory_space<vmem>>, vector<128x128xf32>
    %cst_14 = arith.constant dense<0.000000e+00> : vector<8x128xf32>
    %16 = tpu.matmul %14, %15, %cst_14 {dimension_numbers = #tpu.dot_dimension_numbers<[1], [0], [0], [1], [0, 0, 1, 1], [], []>} : vector<8x128xf32>, vector<128x128xf32>, vector<8x128xf32> -> vector<8x128xf32>
    %c0_15 = arith.constant 0 : index
    %c0_16 = arith.constant 0 : index
    %17 = vector.load %arg8[%c0_15, %c0_16] : memref<1x128xf32, #tpu.memory_space<vmem>>, vector<1x128xf32>
    %18 = vector.broadcast %17 : vector<1x128xf32> to vector<8x128xf32>
    %19 = arith.addf %16, %18 : vector<8x128xf32>
    %cst_17 = arith.constant 0.000000e+00 : f32
    %20 = vector.broadcast %cst_17 : f32 to vector<8x128xf32>
    %21 = arith.maximumf %19, %20 : vector<8x128xf32>
    %c0_18 = arith.constant 0 : index
    %c0_19 = arith.constant 0 : index
    %22 = vector.load %arg5[%c0_18, %c0_19] : memref<128x128xf32, #tpu.memory_space<vmem>>, vector<128x128xf32>
    %cst_20 = arith.constant dense<0.000000e+00> : vector<8x128xf32>
    %23 = tpu.matmul %21, %22, %cst_20 {dimension_numbers = #tpu.dot_dimension_numbers<[1], [0], [0], [1], [0, 0, 1, 1], [], []>} : vector<8x128xf32>, vector<128x128xf32>, vector<8x128xf32> -> vector<8x128xf32>
    %c0_21 = arith.constant 0 : index
    %c0_22 = arith.constant 0 : index
    %24 = vector.load %arg9[%c0_21, %c0_22] : memref<1x128xf32, #tpu.memory_space<vmem>>, vector<1x128xf32>
    %25 = vector.broadcast %24 : vector<1x128xf32> to vector<8x128xf32>
    %26 = arith.addf %23, %25 : vector<8x128xf32>
    %c0_23 = arith.constant 0 : index
    %c0_24 = arith.constant 0 : index
    %27 = vector.load %arg10[%c0_23, %c0_24] : memref<8x128xf32, #tpu.memory_space<vmem>>, vector<8x128xf32>
    tpu.vector_store %arg10[%c0_23, %c0_24], %26 {strides = array<i32>} : memref<8x128xf32, #tpu.memory_space<vmem>>, vector<8x128xf32>,
    return
  }
  func.func @transform_0(%arg0: i32) -> (i32, i32) {
    %c0_i32 = arith.constant 0 : i32
    %c0_i32_0 = arith.constant 0 : i32
    return %arg0, %c0_i32 : i32, i32
  }
  func.func @transform_1(%arg0: i32) -> (i32, i32) {
    %c0_i32 = arith.constant 0 : i32
    %c0_i32_0 = arith.constant 0 : i32
    %c0_i32_1 = arith.constant 0 : i32
    return %c0_i32, %c0_i32_0 : i32, i32
  }
  func.func @transform_2(%arg0: i32) -> (i32, i32) {
    %c0_i32 = arith.constant 0 : i32
    %c0_i32_0 = arith.constant 0 : i32
    %c0_i32_1 = arith.constant 0 : i32
    return %c0_i32, %c0_i32_0 : i32, i32
  }
  func.func @transform_3(%arg0: i32) -> (i32, i32) {
    %c0_i32 = arith.constant 0 : i32
    %c0_i32_0 = arith.constant 0 : i32
    %c0_i32_1 = arith.constant 0 : i32
    return %c0_i32, %c0_i32_0 : i32, i32
  }
  func.func @transform_4(%arg0: i32) -> (i32, i32) {
    %c0_i32 = arith.constant 0 : i32
    %c0_i32_0 = arith.constant 0 : i32
    %c0_i32_1 = arith.constant 0 : i32
    return %c0_i32, %c0_i32_0 : i32, i32
  }
  func.func @transform_5(%arg0: i32) -> (i32, i32) {
    %c0_i32 = arith.constant 0 : i32
    %c0_i32_0 = arith.constant 0 : i32
    %c0_i32_1 = arith.constant 0 : i32
    return %c0_i32, %c0_i32_0 : i32, i32
  }
  func.func @transform_6(%arg0: i32) -> (i32, i32) {
    %c0_i32 = arith.constant 0 : i32
    %c0_i32_0 = arith.constant 0 : i32
    %c0_i32_1 = arith.constant 0 : i32
    return %c0_i32, %c0_i32_0 : i32, i32
  }
  func.func @transform_7(%arg0: i32) -> (i32, i32) {
    %c0_i32 = arith.constant 0 : i32
    %c0_i32_0 = arith.constant 0 : i32
    %c0_i32_1 = arith.constant 0 : i32
    return %c0_i32, %c0_i32_0 : i32, i32
  }
  func.func @transform_8(%arg0: i32) -> (i32, i32) {
    %c0_i32 = arith.constant 0 : i32
    %c0_i32_0 = arith.constant 0 : i32
    %c0_i32_1 = arith.constant 0 : i32
    return %c0_i32, %c0_i32_0 : i32, i32
  }
  func.func @transform_9(%arg0: i32) -> (i32, i32) {
    %c0_i32 = arith.constant 0 : i32
    %c0_i32_0 = arith.constant 0 : i32
    return %arg0, %c0_i32 : i32, i32
  }
}

</mosaic_0001>

<bundles_post_ra>
// kernel: fwd.1
= control target key start
LH: loop header
LB: loop body
LE: loop exit
PB: predicated region body
PF: predicated region fallthrough
CT: control target
= control target key end

     0   :  { %14 = vsyncpa [#allocation3], 0  ;;  %s1073_s0 = inlined_call_operand.vmem [shape: f32[8,128], index: 0, kind: input, shape index: {}]   ;;  %s1074_s1 = inlined_call_operand.hbm [shape: f32[128,128], index: 1, kind: input, shape index: {}]   ;;  %s1075_s2 = inlined_call_operand.hbm [shape: f32[128,128], index: 2, kind: input, shape index: {}]   ;;  %s1076_s3 = inlined_call_operand.hbm [shape: f32[128,128], index: 3, kind: input, shape index: {}]   ;;  %s1077_s4 = inlined_call_operand.hbm [shape: f32[128,128], index: 4, kind: input, shape index: {}]   ;;  %s1078_s5 = inlined_call_operand.vmem [shape: f32[1,128], index: 5, kind: input, shape index: {}]   ;;  %s1079_s6 = inlined_call_operand.vmem [shape: f32[1,128], index: 6, kind: input, shape index: {}]   ;;  %s1080_s7 = inlined_call_operand.vmem [shape: f32[1,128], index: 7, kind: input, shape index: {}]   ;;  %s1081_s8 = inlined_call_operand.vmem [shape: f32[1,128], index: 8, kind: input, shape index: {}]   ;;  %s1082_s9 = inlined_call_operand.vmem [shape: f32[8,128], index: 9, kind: output, shape index: {}]  }
   0x1   :  { %15 = vsyncpa [#allocation5], 0 }
   0x2   :  { %16 = vsyncpa [#allocation8], 0  ;;  %s882_s30 = smov [#allocation4]   ;;  %s883_s11 = smov [#allocation2]  }
   0x3   :  { %s36_s10 = sshll.u32 %s882_s30, 4  ;;  %s24_s12 = sshll.u32 %s883_s11, 4  ;;  %s37_s10 = int_to_ptr.vmem [resolvable:$true] %s36_s10  ;;  %s941_s12 = int_to_ptr.vmem [resolvable:$true] %s24_s12 }
   0x4   :  { %s788_s15 = scalar_lea.hbm %s1075_s2, 2048 }
   0x5   :  { %p789_p0 = scmp.ne.s32.totalorder %s1075_s2, %s788_s15  ;;  %p792_p1 = scmp.lt.u32.totalorder %s788_s15, %s1075_s2 }
   0x7   :  { %p794_p2 = pnand %p792_p1, %p789_p0 }
   0x9   :  { %797 = shalt.err (!%p794_p2)
}
   0xa   :  { %s798_s20 = scalar_lea.vmem %s37_s10, 2048  ;;  %p803_p4 = scmp.lt.s32.totalorder %s37_s10, %s37_s10 }
   0xb   :  { %p799_p3 = scmp.ne.s32.totalorder %s37_s10, %s798_s20  ;;  %p804_p5 = scmp.lt.s32.totalorder %s798_s20, %s798_s20 }
   0xd   :  { %p805_p6 = por %p804_p5, %p803_p4 }
   0xf   :  { %p806_p7 = pnand %p805_p6, %p799_p3 }
  0x11   :  { %809 = shalt.err (!%p806_p7)
}
  0x12   :  { %s884_s21 = smov 128   ;;  %s885_s22 = smov 8  }
  0x13   :  { %42 = dma.hbm_to_vmem [thread:$0]  %s1075_s2, 2048, %s37_s10, [#allocation5], %s884_s21, %s884_s21, %s885_s22  }
  0x14   :  { %s810_s27 = scalar_lea.hbm %s1074_s1, 2048 }
  0x15   :  { %p811_p8 = scmp.ne.s32.totalorder %s1074_s1, %s810_s27  ;;  %p814_p9 = scmp.lt.u32.totalorder %s810_s27, %s1074_s1 }
  0x17   :  { %p816_p10 = pnand %p814_p9, %p811_p8 }
  0x19   :  { %819 = shalt.err (!%p816_p10)
}
  0x1a   :  { %s820_s13 = scalar_lea.vmem %s941_s12, 2048  ;;  %p825_p12 = scmp.lt.s32.totalorder %s941_s12, %s941_s12 }
  0x1b   :  { %p821_p11 = scmp.ne.s32.totalorder %s941_s12, %s820_s13  ;;  %p826_p13 = scmp.lt.s32.totalorder %s820_s13, %s820_s13 }
  0x1d   :  { %p827_p0 = por %p826_p13, %p825_p12 }
  0x1f   :  { %p828_p1 = pnand %p827_p0, %p821_p11 }
  0x21   :  { %831 = shalt.err (!%p828_p1)
}
  0x22   :  { %30 = dma.hbm_to_vmem [thread:$0]  %s1074_s1, 2048, %s941_s12, [#allocation3], %s884_s21, %s884_s21, %s885_s22  }
  0x23   :  { %s886_s14 = smov [#allocation6]   ;;  %s887_s16 = smov [#allocation7]  }
  0x24   :  { %s48_s15 = sshll.u32 %s886_s14, 4  ;;  %s60_s17 = sshll.u32 %s887_s16, 4  ;;  %s49_s15 = int_to_ptr.vmem [resolvable:$true] %s48_s15  ;;  %s978_s17 = int_to_ptr.vmem [resolvable:$true] %s60_s17 }
  0x25   :  { %s832_s20 = scalar_lea.hbm %s1076_s3, 2048 }
  0x26   :  { %p833_p2 = scmp.ne.s32.totalorder %s1076_s3, %s832_s20  ;;  %p836_p3 = scmp.lt.u32.totalorder %s832_s20, %s1076_s3 }
  0x28   :  { %p838_p4 = pnand %p836_p3, %p833_p2 }
  0x2a   :  { %841 = shalt.err (!%p838_p4)
}
  0x2b   :  { %s842_s1 = scalar_lea.vmem %s49_s15, 2048  ;;  %p847_p6 = scmp.lt.s32.totalorder %s49_s15, %s49_s15 }
  0x2c   :  { %p843_p5 = scmp.ne.s32.totalorder %s49_s15, %s842_s1  ;;  %p848_p7 = scmp.lt.s32.totalorder %s842_s1, %s842_s1 }
  0x2e   :  { %p849_p8 = por %p848_p7, %p847_p6 }
  0x30   :  { %p850_p9 = pnand %p849_p8, %p843_p5 }
  0x32   :  { %853 = shalt.err (!%p850_p9)
}
  0x33   :  { %54 = dma.hbm_to_vmem [thread:$0]  %s1076_s3, 2048, %s49_s15, [#allocation5], %s884_s21, %s884_s21, %s885_s22  }
  0x34   :  { %s854_s30 = scalar_lea.hbm %s1077_s4, 2048 }
  0x35   :  { %p855_p10 = scmp.ne.s32.totalorder %s1077_s4, %s854_s30  ;;  %p858_p11 = scmp.lt.u32.totalorder %s854_s30, %s1077_s4 }
  0x37   :  { %p860_p12 = pnand %p858_p11, %p855_p10 }
  0x39   :  { %863 = shalt.err (!%p860_p12)
}
  0x3a   :  { %s864_s14 = scalar_lea.vmem %s978_s17, 2048  ;;  %p869_p0 = scmp.lt.s32.totalorder %s978_s17, %s978_s17 }
  0x3b   :  { %p865_p13 = scmp.ne.s32.totalorder %s978_s17, %s864_s14  ;;  %p870_p1 = scmp.lt.s32.totalorder %s864_s14, %s864_s14 }
  0x3d   :  { %p871_p2 = por %p870_p1, %p869_p0 }
  0x3f   :  { %p872_p3 = pnand %p871_p2, %p865_p13 }
  0x41   :  { %875 = shalt.err (!%p872_p3)
}
  0x42   :  { %66 = dma.hbm_to_vmem [thread:$0]  %s1077_s4, 2048, %s978_s17, [#allocation8], %s884_s21, %s884_s21, %s885_s22  }
  0x43   :  { %876 = dma.done.wait [#allocation3], 2048  }
  0x44   :  { %877 = vsyncadd [#allocation3], 4294965248 }
  0x45   :  { %878 = dma.done.wait [#allocation5], 4096  }
  0x46   :  { %879 = vsyncadd [#allocation5], 4294963200 }
  0x47   :  { %880 = dma.done.wait [#allocation8], 2048  }
  0x48   :  { %881 = vsyncadd [#allocation8], 4294965248  ;;  %v888_v0 = vmov 0.0|0.0   ;;  %vm889_vm0 = vmmov 0   ;;  %v890_v1 = vmov 0.0   ;;  %v88_v2 = vld [vmem:[#allocation2] sm:$0xff] }
  0x49   :  { %683 = vmatprep.subr.bf16.mxu0 %v888_v0  ;;  %575 = vmatprep.mubr.msk.f32.mxu0 %vm889_vm0, %v890_v1  ;;  %v89_v3 = vld [vmem:[#allocation2 + $0x8] sm:$0xff]  ;;  %v90_v4 = vld [vmem:[#allocation2 + $0x10] sm:$0xff]  ;;  %v91_v6 = vld [vmem:[#allocation2 + $0x18] sm:$0xff] }
  0x4a   :  { %707 = vmatprep.subr.bf16.mxu1 %v888_v0  ;;  %610 = vmatprep.mubr.msk.f32.mxu1 %vm889_vm0, %v890_v1  ;;  %v684_v5 = vpack.c.bf16 %v89_v3, %v88_v2  ;;  %v687_v7 = vpack.c.bf16 %v91_v6, %v90_v4  ;;  %v92_v8 = vld [vmem:[#allocation2 + $0x20] sm:$0xff]  ;;  %v93_v9 = vld [vmem:[#allocation2 + $0x28] sm:$0xff]  ;;  %v184_v12 = vld [vmem:[#allocation4 + $0x10] sm:$0xff] }
  0x4b   :  { %v182_v10 = vld [vmem:[#allocation4] sm:$0xff]  ;;  %v183_v11 = vld [vmem:[#allocation4 + $0x8] sm:$0xff]  ;;  %v185_v13 = vld [vmem:[#allocation4 + $0x18] sm:$0xff]  ;;  %v690_v14 = vpack.c.bf16 %v93_v9, %v92_v8 }
  0x4c   :  { %685 = vmatpush3.bf16.msra.mxu0 %v684_v5  ;;  %v708_v15 = vpack.c.bf16 %v183_v11, %v182_v10  ;;  %v94_v16 = vld [vmem:[#allocation2 + $0x30] sm:$0xff]  ;;  %v95_v17 = vld [vmem:[#allocation2 + $0x38] sm:$0xff]  ;;  %v711_v18 = vpack.c.bf16 %v185_v13, %v184_v12  ;;  %v186_v19 = vld [vmem:[#allocation4 + $0x20] sm:$0xff] }
  0x4d   :  { %686 = vmatprep.subr.bf16.mxu0 %v888_v0  ;;  %v187_v20 = vld [vmem:[#allocation4 + $0x28] sm:$0xff]  ;;  %v693_v21 = vpack.c.bf16 %v95_v17, %v94_v16  ;;  %v96_v22 = vld [vmem:[#allocation2 + $0x40] sm:$0xff]  ;;  %v188_v25 = vld [vmem:[#allocation4 + $0x30] sm:$0xff] }
  0x4e   :  { %709 = vmatpush3.bf16.msra.mxu1 %v708_v15  ;;  %v97_v23 = vld [vmem:[#allocation2 + $0x48] sm:$0xff]  ;;  %v714_v24 = vpack.c.bf16 %v187_v20, %v186_v19  ;;  %v189_v26 = vld [vmem:[#allocation4 + $0x38] sm:$0xff]  ;;  %v98_v28 = vld [vmem:[#allocation2 + $0x50] sm:$0xff] }
  0x4f   :  { %710 = vmatprep.subr.bf16.mxu1 %v888_v0  ;;  %v696_v27 = vpack.c.bf16 %v97_v23, %v96_v22  ;;  %v99_v29 = vld [vmem:[#allocation2 + $0x58] sm:$0xff]  ;;  %v717_v30 = vpack.c.bf16 %v189_v26, %v188_v25  ;;  %v190_v31 = vld [vmem:[#allocation4 + $0x40] sm:$0xff]  ;;  %v191_v32 = vld [vmem:[#allocation4 + $0x48] sm:$0xff] }
  0x50   :  { %688 = vmatpush3.bf16.msra.mxu0 %v687_v7  ;;  %v699_v33 = vpack.c.bf16 %v99_v29, %v98_v28  ;;  %v100_v34 = vld [vmem:[#allocation2 + $0x60] sm:$0xff]  ;;  %v101_v35 = vld [vmem:[#allocation2 + $0x68] sm:$0xff]  ;;  %v720_v36 = vpack.c.bf16 %v191_v32, %v190_v31  ;;  %v192_v37 = vld [vmem:[#allocation4 + $0x50] sm:$0xff] }
  0x51   :  { %689 = vmatprep.subr.bf16.mxu0 %v888_v0  ;;  %v193_v38 = vld [vmem:[#allocation4 + $0x58] sm:$0xff]  ;;  %v702_v39 = vpack.c.bf16 %v101_v35, %v100_v34  ;;  %v102_v40 = vld [vmem:[#allocation2 + $0x70] sm:$0xff]  ;;  %v194_v43 = vld [vmem:[#allocation4 + $0x60] sm:$0xff] }
  0x52   :  { %712 = vmatpush3.bf16.msra.mxu1 %v711_v18  ;;  %v103_v41 = vld [vmem:[#allocation2 + $0x78] sm:$0xff]  ;;  %v723_v42 = vpack.c.bf16 %v193_v38, %v192_v37  ;;  %v195_v44 = vld [vmem:[#allocation4 + $0x68] sm:$0xff]  ;;  %v87_v47 = vld [vmem:[%s1073_s0] sm:$0xff] }
  0x53   :  { %713 = vmatprep.subr.bf16.mxu1 %v888_v0  ;;  %v705_v45 = vpack.c.bf16 %v103_v41, %v102_v40  ;;  %v726_v46 = vpack.c.bf16 %v195_v44, %v194_v43  ;;  %v196_v48 = vld [vmem:[#allocation4 + $0x70] sm:$0xff]  ;;  %v197_v49 = vld [vmem:[#allocation4 + $0x78] sm:$0xff]  ;;  %v276_v51 = vld [vmem:[#allocation6] sm:$0xff] }
  0x54   :  { %691 = vmatpush3.bf16.msra.mxu0 %v690_v14  ;;  %v729_v50 = vpack.c.bf16 %v197_v49, %v196_v48  ;;  %v277_v52 = vld [vmem:[#allocation6 + $0x8] sm:$0xff]  ;;  %v278_v53 = vld [vmem:[#allocation6 + $0x10] sm:$0xff]  ;;  %v279_v55 = vld [vmem:[#allocation6 + $0x18] sm:$0xff] }
  0x55   :  { %692 = vmatprep.subr.bf16.mxu0 %v888_v0  ;;  %v732_v54 = vpack.c.bf16 %v277_v52, %v276_v51  ;;  %v735_v56 = vpack.c.bf16 %v279_v55, %v278_v53  ;;  %v280_v57 = vld [vmem:[#allocation6 + $0x20] sm:$0xff]  ;;  %v281_v58 = vld [vmem:[#allocation6 + $0x28] sm:$0xff]  ;;  %v282_v60 = vld [vmem:[#allocation6 + $0x30] sm:$0xff] }
  0x56   :  { %715 = vmatpush3.bf16.msra.mxu1 %v714_v24  ;;  %v738_v59 = vpack.c.bf16 %v281_v58, %v280_v57  ;;  %v283_v61 = vld [vmem:[#allocation6 + $0x38] sm:$0xff]  ;;  %v284_v63 = vld [vmem:[#allocation6 + $0x40] sm:$0xff]  ;;  %v285_v2 = vld [vmem:[#allocation6 + $0x48] sm:$0xff] }
  0x57   :  { %716 = vmatprep.subr.bf16.mxu1 %v888_v0  ;;  %v741_v62 = vpack.c.bf16 %v283_v61, %v282_v60  ;;  %v744_v3 = vpack.c.bf16 %v285_v2, %v284_v63  ;;  %v286_v4 = vld [vmem:[#allocation6 + $0x50] sm:$0xff]  ;;  %v287_v5 = vld [vmem:[#allocation6 + $0x58] sm:$0xff]  ;;  %v288_v7 = vld [vmem:[#allocation6 + $0x60] sm:$0xff] }
  0x58   :  { %694 = vmatpush3.bf16.msra.mxu0 %v693_v21  ;;  %v747_v6 = vpack.c.bf16 %v287_v5, %v286_v4  ;;  %v289_v8 = vld [vmem:[#allocation6 + $0x68] sm:$0xff]  ;;  %v471_v10 = vld [vmem:[%s1078_s5] ss:$0 sm:$0xff]  ;;  %v290_v15 = vld [vmem:[#allocation6 + $0x70] sm:$0xff] }
  0x59   :  { %695 = vmatprep.subr.bf16.mxu0 %v888_v0  ;;  %v750_v9 = vpack.c.bf16 %v289_v8, %v288_v7  ;;  %v291_v16 = vld [vmem:[#allocation6 + $0x78] sm:$0xff]  ;;  %v370_v18 = vld [vmem:[#allocation7] sm:$0xff]  ;;  %v371_v19 = vld [vmem:[#allocation7 + $0x8] sm:$0xff] }
  0x5a   :  { %718 = vmatpush3.bf16.msra.mxu1 %v717_v30  ;;  %v753_v17 = vpack.c.bf16 %v291_v16, %v290_v15  ;;  %v372_v20 = vld [vmem:[#allocation7 + $0x10] sm:$0xff]  ;;  %v756_v21 = vpack.c.bf16 %v371_v19, %v370_v18  ;;  %v373_v22 = vld [vmem:[#allocation7 + $0x18] sm:$0xff]  ;;  %v374_v24 = vld [vmem:[#allocation7 + $0x20] sm:$0xff] }
  0x5b   :  { %719 = vmatprep.subr.bf16.mxu1 %v888_v0  ;;  %v759_v23 = vpack.c.bf16 %v373_v22, %v372_v20  ;;  %v375_v25 = vld [vmem:[#allocation7 + $0x28] sm:$0xff]  ;;  %v378_v29 = vld [vmem:[#allocation7 + $0x40] sm:$0xff]  ;;  %v380_v32 = vld [vmem:[#allocation7 + $0x50] sm:$0xff] }
  0x5c   :  { %697 = vmatpush3.bf16.msra.mxu0 %v696_v27  ;;  %v762_v26 = vpack.c.bf16 %v375_v25, %v374_v24  ;;  %v377_v27 = vld [vmem:[#allocation7 + $0x38] sm:$0xff]  ;;  %v379_v30 = vld [vmem:[#allocation7 + $0x48] sm:$0xff]  ;;  %v382_v35 = vld [vmem:[#allocation7 + $0x60] sm:$0xff] }
  0x5d   :  { %698 = vmatprep.subr.bf16.mxu0 %v888_v0  ;;  %v768_v31 = vpack.c.bf16 %v379_v30, %v378_v29  ;;  %v472_v38 = vld [vmem:[%s1079_s6] ss:$0 sm:$0xff]  ;;  %v384_v43 = vld [vmem:[#allocation7 + $0x70] sm:$0xff]  ;;  %v385_v44 = vld [vmem:[#allocation7 + $0x78] sm:$0xff] }
  0x5e   :  { %721 = vmatpush3.bf16.msra.mxu1 %v720_v36  ;;  %v383_v36 = vld [vmem:[#allocation7 + $0x68] sm:$0xff] }
  0x5f   :  { %722 = vmatprep.subr.bf16.mxu1 %v888_v0  ;;  %v774_v37 = vpack.c.bf16 %v383_v36, %v382_v35 }
  0x60   :  { %700 = vmatpush3.bf16.msra.mxu0 %v699_v33  ;;  %v381_v33 = vld [vmem:[#allocation7 + $0x58] sm:$0xff] }
  0x61   :  { %701 = vmatprep.subr.bf16.mxu0 %v888_v0  ;;  %v771_v34 = vpack.c.bf16 %v381_v33, %v380_v32 }
  0x62   :  { %724 = vmatpush3.bf16.msra.mxu1 %v723_v42 }
  0x63   :  { %725 = vmatprep.subr.bf16.mxu1 %v888_v0 }
  0x64   :  { %703 = vmatpush3.bf16.msra.mxu0 %v702_v39 }
  0x65   :  { %704 = vmatprep.subr.bf16.mxu0 %v888_v0 }
  0x66   :  { %727 = vmatpush3.bf16.msra.mxu1 %v726_v46  ;;  %v473_v46 = vld [vmem:[%s1080_s7] ss:$0 sm:$0xff] }
  0x67   :  { %728 = vmatprep.subr.bf16.mxu1 %v888_v0 }
  0x68   :  { %706 = vmatpush3.bf16.msra.mxu0 %v705_v45  ;;  %v777_v45 = vpack.c.bf16 %v385_v44, %v384_v43 }
  0x69   :  { %731 = vmatprep.subr.bf16.mxu0 %v888_v0 }
  0x6a   :  { %730 = vmatpush3.bf16.msra.mxu1 %v729_v50  ;;  %v474_v50 = vld [vmem:[%s1081_s8] ss:$0 sm:$0xff] }
  0x6b   :  { %576 = vmatmul.mubr.f32.vlgmr.msra.gmra.mrb[0].mxu0 %v87_v47  ;;  %755 = vmatprep.subr.bf16.mxu1 %v888_v0 }
  0x6c   :  { %645 = vmatprep.mubr.msk.f32.mxu0 %vm889_vm0, %v890_v1  ;;  %733 = vmatpush3.bf16.msra.mxu0 %v732_v54 }
  0x6d   :  { %734 = vmatprep.subr.bf16.mxu0 %v888_v0 }
  0x70   :  { %736 = vmatpush3.bf16.msra.mxu0 %v735_v56 }
  0x71   :  { %737 = vmatprep.subr.bf16.mxu0 %v888_v0 }
  0x74   :  { %739 = vmatpush3.bf16.msra.mxu0 %v738_v59 }
  0x75   :  { %740 = vmatprep.subr.bf16.mxu0 %v888_v0 }
  0x78   :  { %742 = vmatpush3.bf16.msra.mxu0 %v741_v62 }
  0x79   :  { %743 = vmatprep.subr.bf16.mxu0 %v888_v0 }
  0x7c   :  { %745 = vmatpush3.bf16.msra.mxu0 %v744_v3 }
  0x7d   :  { %746 = vmatprep.subr.bf16.mxu0 %v888_v0 }
  0x80   :  { %748 = vmatpush3.bf16.msra.mxu0 %v747_v6 }
  0x81   :  { %749 = vmatprep.subr.bf16.mxu0 %v888_v0 }
  0x84   :  { %751 = vmatpush3.bf16.msra.mxu0 %v750_v9 }
  0x85   :  { %752 = vmatprep.subr.bf16.mxu0 %v888_v0 }
  0x88   :  { %754 = vmatpush3.bf16.msra.mxu0 %v753_v17 }
 0x13e   :  { %v177_v11 = vpop.f32.mrb[0].mxu0 }
 0x13f   :  { %v178_v12 = vadd.f32 %v471_v10, %v177_v11  ;;  %v577_v13 = vpop.f32.mrb[1].mxu0 }
 0x141   :  { %v181_v14 = vmax.f32 %v178_v12, 0.0 }
 0x143   :  { %611 = vmatmul.mubr.f32.vlgmr.msra.gmra.mrb[0].mxu1 %v181_v14 }
 0x144   :  { %680 = vmatprep.mubr.msk.f32.mxu1 %vm889_vm0, %v890_v1  ;;  %757 = vmatpush3.bf16.msra.mxu1 %v756_v21  ;;  %v376_v1 = vld [vmem:[#allocation7 + $0x30] sm:$0xff] }
 0x145   :  { %758 = vmatprep.subr.bf16.mxu1 %v888_v0  ;;  %v765_v28 = vpack.c.bf16 %v377_v27, %v376_v1 }
 0x148   :  { %760 = vmatpush3.bf16.msra.mxu1 %v759_v23 }
 0x149   :  { %761 = vmatprep.subr.bf16.mxu1 %v888_v0 }
 0x14c   :  { %763 = vmatpush3.bf16.msra.mxu1 %v762_v26 }
 0x14d   :  { %764 = vmatprep.subr.bf16.mxu1 %v888_v0 }
 0x150   :  { %766 = vmatpush3.bf16.msra.mxu1 %v765_v28 }
 0x151   :  { %767 = vmatprep.subr.bf16.mxu1 %v888_v0 }
 0x154   :  { %769 = vmatpush3.bf16.msra.mxu1 %v768_v31 }
 0x155   :  { %770 = vmatprep.subr.bf16.mxu1 %v888_v0 }
 0x158   :  { %772 = vmatpush3.bf16.msra.mxu1 %v771_v34 }
 0x159   :  { %773 = vmatprep.subr.bf16.mxu1 %v888_v0 }
 0x15c   :  { %775 = vmatpush3.bf16.msra.mxu1 %v774_v37 }
 0x15d   :  { %776 = vmatprep.subr.bf16.mxu1 %v888_v0 }
 0x160   :  { %778 = vmatpush3.bf16.msra.mxu1 %v777_v45 }
 0x216   :  { %v271_v39 = vpop.f32.mrb[0].mxu1 }
 0x217   :  { %v272_v40 = vadd.f32 %v472_v38, %v271_v39  ;;  %v612_v41 = vpop.f32.mrb[1].mxu1 }
 0x219   :  { %v275_v42 = vmax.f32 %v272_v40, 0.0 }
 0x21b   :  { %646 = vmatmul.mubr.f32.vlgmr.msra.gmra.mrb[2].mxu0 %v275_v42 }
 0x2ee   :  { %v365_v47 = vpop.f32.mrb[2].mxu0 }
 0x2ef   :  { %v366_v48 = vadd.f32 %v473_v46, %v365_v47  ;;  %v647_v0 = vpop.f32.mrb[3].mxu0 }
 0x2f1   :  { %v369_v49 = vmax.f32 %v366_v48, 0.0 }
 0x2f3   :  { %681 = vmatmul.mubr.f32.vlgmr.msra.gmra.mrb[2].mxu1 %v369_v49 }
 0x3c6   :  { %v459_v51 = vpop.f32.mrb[2].mxu1 }
 0x3c7   :  { %v460_v52 = vadd.f32 %v474_v50, %v459_v51  ;;  %v682_v53 = vpop.f32.mrb[3].mxu1 }
 0x3c9   :  { %463 = vst [vmem:[%s1082_s9] sm:$0xff] %v460_v52 }
 0x3ca   :  { %468 = vsyncpa [#allocation3], 1 }
 0x3cb   :  { %469 = vsyncpa [#allocation5], 1 }
 0x3cc   :  { %470 = vsyncpa [#allocation8], 1 }

</bundles_post_ra>
